<compile_context>
chip_gen: v5e
topology: v5e:2x2
jax: 0.10.0
libtpu: 0.0.40
codegen_flags: <defaults>
</compile_context>

<pallas_src>
import jax
import jax.numpy as jnp
from jax.experimental import pallas as pl
from jax.experimental.pallas import tpu as pltpu

LN_EPS = 1e-5


def make_critic_kernel(fuse_l2: bool, hidden_dim: int):
    """Builds the fused critic kernel. fuse_l2 selects block-diag layer-2 (H<128)
    vs. two per-head H x H dots (H>=128)."""
    H = hidden_dim

    def critic_kernel(obs_ref, act_ref, wt_ref, trunk_ref,
                      w1h_ref, w1a_ref, w2_ref, w3_ref, bias_ref, out_ref):
        wdt = wt_ref.dtype                       # f32 or bf16 weight slabs
        obs = obs_ref[...]
        act = act_ref[...]

        # ---- trunk: Linear -> LayerNorm -> Tanh (activations in f32) ----
        # trunk_ref rows: 0 = linear bias, 1 = LN gamma, 2 = LN beta   (each (1, F))
        t = jnp.dot(obs.astype(wdt), wt_ref[...],
                    preferred_element_type=jnp.float32) + trunk_ref[0:1, :]
        mean = jnp.mean(t, axis=-1, keepdims=True)
        var = jnp.mean((t - mean) * (t - mean), axis=-1, keepdims=True)
        h = (t - mean) * jax.lax.rsqrt(var + LN_EPS)
        h = jnp.tanh(h * trunk_ref[1:2, :] + trunk_ref[2:3, :])

        # ---- layer 1, both heads fused along N; concat replaced by two dots ----
        z = (jnp.dot(h.astype(wdt), w1h_ref[...], preferred_element_type=jnp.float32)
             + jnp.dot(act.astype(wdt), w1a_ref[...], preferred_element_type=jnp.float32)
             + bias_ref[0:1, :])
        z = jnp.maximum(z, 0.0)                  # relu, (bb, 2H)

        # ---- layer 2 ----
        if fuse_l2:
            # small H: block-diagonal (2H, 2H) weight, single matmul
            z = (jnp.dot(z.astype(wdt), w2_ref[...],
                         preferred_element_type=jnp.float32) + bias_ref[1:2, :])
        else:
            # large H: two H x H dots (avoids doubled FLOPs / 4x weight bytes)
            z1 = jnp.dot(z[:, :H].astype(wdt), w2_ref[0],
                         preferred_element_type=jnp.float32)
            z2 = jnp.dot(z[:, H:].astype(wdt), w2_ref[1],
                         preferred_element_type=jnp.float32)
            z = jnp.concatenate([z1, z2], axis=-1) + bias_ref[1:2, :]
        z = jnp.maximum(z, 0.0)                  # relu, (bb, 2H)

        # ---- layer 3, heads fused: (2H, 2) -> (bb, 2) store [q1 | q2] ----
        out_ref[...] = (jnp.dot(z.astype(wdt), w3_ref[...],
                                preferred_element_type=jnp.float32)
                        + bias_ref[2:3, 0:2])

    return critic_kernel


def _round_up(x, m):
    return ((x + m - 1) // m) * m


def critic_forward(obs, action, packed, *, block_b=1024):
    """Fused critic forward. Weights stay VMEM-resident (constant index_map); the batch
    is gridded with 'parallel' semantics and padded to a multiple of the tile."""
    wt, trunk, w1h, w1a, w2p, w3f, biases = packed
    B, repr_dim = obs.shape
    A = action.shape[1]
    H = biases.shape[1] // 2
    fuse_l2 = (w2p.ndim == 2)

    # Tile selection: multiple of 8, large (amortize ~0.35us/step), and when B >= 16
    # capped at ceil(B/2) so the grid has >= 2 steps (v7x 2-TC sharding).
    if B >= 16:
        bb = min(block_b, _round_up(-(-B // 2), 8))
    else:
        bb = _round_up(B, 8)
    bb = max(bb, 8)
    B_pad = _round_up(B, bb)
    if B_pad != B:
        pad = B_pad - B
        obs = jnp.pad(obs, ((0, pad), (0, 0)))
        action = jnp.pad(action, ((0, pad), (0, 0)))
    grid = (B_pad // bb,)

    vmem = pltpu.MemorySpace.VMEM

    def stream(shape):
        return pl.BlockSpec(shape, lambda i: (i, 0), memory_space=vmem)

    def full(a):
        return pl.BlockSpec(a.shape, lambda i, nd=a.ndim: (0,) * nd, memory_space=vmem)

    in_specs = [
        stream((bb, repr_dim)),        # obs
        stream((bb, A)),               # action
        full(wt), full(trunk), full(w1h), full(w1a), full(w2p), full(w3f), full(biases),
    ]
    out_specs = pl.BlockSpec((bb, 2), lambda i: (i, 0), memory_space=vmem)

    q = pl.pallas_call(
        make_critic_kernel(fuse_l2, H),
        out_shape=jax.ShapeDtypeStruct((B_pad, 2), jnp.float32),
        grid=grid,
        in_specs=in_specs,
        out_specs=out_specs,
        compiler_params=pltpu.CompilerParams(dimension_semantics=("parallel",)),
    )(obs, action, wt, trunk, w1h, w1a, w2p, w3f, biases)

    q = q[:B]                          # drop padded rows
    return q[:, 0:1], q[:, 1:2]


def init_raw_params(key, repr_dim, action_dim, feature_dim, hidden_dim):
    """Per-layer params in PyTorch-equivalent layout: weights (in, out), biases 1-D."""
    ks = jax.random.split(key, 16)
    s = 0.1
    w = lambda k, shape: (s * jax.random.normal(k, shape)).astype(jnp.float32)

    wt = w(ks[0], (repr_dim, feature_dim))
    bt = w(ks[1], (feature_dim,))
    gamma = jnp.ones((feature_dim,), jnp.float32)
    beta = jnp.zeros((feature_dim,), jnp.float32)

    fa = feature_dim + action_dim
    w1 = w(ks[2], (fa, hidden_dim));  b1 = w(ks[3], (hidden_dim,))
    w2 = w(ks[4], (hidden_dim, hidden_dim)); b2 = w(ks[5], (hidden_dim,))
    w3 = w(ks[6], (hidden_dim, 1));   b3 = w(ks[7], (1,))
    w4 = w(ks[8], (fa, hidden_dim));  b4 = w(ks[9], (hidden_dim,))
    w5 = w(ks[10], (hidden_dim, hidden_dim)); b5 = w(ks[11], (hidden_dim,))
    w6 = w(ks[12], (hidden_dim, 1));  b6 = w(ks[13], (1,))

    return (wt, bt, gamma, beta, w1, b1, w2, b2, w3, b3, w4, b4, w5, b5, w6, b6)


def pack_params(raw, hidden_dim, *, param_dtype=jnp.float32):
    """Pack 16 raw params into 7 kernel operands (head fusion, split layer-1 weight,
    size-dependent layer-2 packing, f32 bias/LN slabs, optional bf16 weight slabs)."""
    (wt, bt, gamma, beta, w1, b1, w2, b2, w3, b3, w4, b4, w5, b5, w6, b6) = raw
    H = hidden_dim
    F_dim = wt.shape[1]

    trunk = jnp.stack([bt, gamma, beta], axis=0).astype(jnp.float32)     # (3, F)

    w1f = jnp.concatenate([w1, w4], axis=1)                              # (F+A, 2H)
    w1h = w1f[:F_dim]                                                    # (F, 2H)
    w1a = w1f[F_dim:]                                                    # (A, 2H)

    if H < 128:
        zH = jnp.zeros((H, H), jnp.float32)
        w2p = jnp.block([[w2, zH], [zH, w5]])                            # (2H, 2H)
    else:
        w2p = jnp.stack([w2, w5], axis=0)                                # (2, H, H)

    z1 = jnp.zeros((H, 1), jnp.float32)
    w3f = jnp.block([[w3, z1], [z1, w6]])                                # (2H, 2)

    b1f = jnp.concatenate([b1, b4])
    b2f = jnp.concatenate([b2, b5])
    b3f = jnp.concatenate([b3, b6, jnp.zeros((2 * H - 2,), jnp.float32)])
    biases = jnp.stack([b1f, b2f, b3f], axis=0).astype(jnp.float32)      # (3, 2H)

    wt = wt.astype(param_dtype)
    w1h = w1h.astype(param_dtype)
    w1a = w1a.astype(param_dtype)
    w2p = w2p.astype(param_dtype)
    w3f = w3f.astype(param_dtype)
    return (wt, trunk, w1h, w1a, w2p, w3f, biases)


def critic_reference(obs, action, raw):
    """Pure-JAX mirror of the PyTorch forward (unfused), for validation."""
    (wt, bt, gamma, beta, w1, b1, w2, b2, w3, b3, w4, b4, w5, b5, w6, b6) = raw
    t = obs @ wt + bt
    mean = jnp.mean(t, axis=-1, keepdims=True)
    var = jnp.mean((t - mean) ** 2, axis=-1, keepdims=True)
    h = jnp.tanh((t - mean) / jnp.sqrt(var + LN_EPS) * gamma + beta)
    ha = jnp.concatenate([h, action], axis=-1)
    q1 = jax.nn.relu(ha @ w1 + b1)
    q1 = jax.nn.relu(q1 @ w2 + b2)
    q1 = q1 @ w3 + b3
    q2 = jax.nn.relu(ha @ w4 + b4)
    q2 = jax.nn.relu(q2 @ w5 + b5)
    q2 = q2 @ w6 + b6
    return q1, q2


if __name__ == "__main__":
    key = jax.random.PRNGKey(0)
    k_obs, k_act, k_par, k_next = jax.random.split(key, 4)

    # ---- config 1: small dims (H < 128 -> fused block-diag layer 2) ----
    batch, repr_dim, action_dim, feature_dim, hidden_dim = 4, 32, 8, 32, 32
    obs = jax.random.normal(k_obs, (batch, repr_dim), dtype=jnp.float32)
    action = jax.random.normal(k_act, (batch, action_dim), dtype=jnp.float32)
    raw = init_raw_params(k_par, repr_dim, action_dim, feature_dim, hidden_dim)

    packed = pack_params(raw, hidden_dim)                       # f32 weight slabs
    q1, q2 = critic_forward(obs, action, packed)
    jax.block_until_ready((q1, q2))
    q1_ref, q2_ref = critic_reference(obs, action, raw)
    assert jnp.allclose(q1, q1_ref, atol=1e-5, rtol=1e-5)
    assert jnp.allclose(q2, q2_ref, atol=1e-5, rtol=1e-5)

    # bf16 weight slabs (halves weight DMA / VMEM; activations stay f32)
    packed_bf16 = pack_params(raw, hidden_dim, param_dtype=jnp.bfloat16)
    q1b, q2b = critic_forward(obs, action, packed_bf16)
    jax.block_until_ready((q1b, q2b))
    assert jnp.allclose(q1b, q1_ref, atol=1e-1, rtol=1e-1)
    assert jnp.allclose(q2b, q2_ref, atol=1e-1, rtol=1e-1)

    # ---- config 2: H >= 128 (split layer-2 path), non-multiple batch -> padded,
    #      multi-step 'parallel' grid ----
    batch2, repr2, act_dim2, feat2, hid2 = 37, 64, 8, 64, 128
    ko, ka, kp = jax.random.split(k_next, 3)
    obs2 = jax.random.normal(ko, (batch2, repr2), dtype=jnp.float32)
    action2 = jax.random.normal(ka, (batch2, act_dim2), dtype=jnp.float32)
    raw2 = init_raw_params(kp, repr2, act_dim2, feat2, hid2)
    packed2 = pack_params(raw2, hid2)
    q1c, q2c = critic_forward(obs2, action2, packed2)
    jax.block_until_ready((q1c, q2c))
    q1c_ref, q2c_ref = critic_reference(obs2, action2, raw2)
    assert jnp.allclose(q1c, q1c_ref, atol=1e-4, rtol=1e-4)
    assert jnp.allclose(q2c, q2c_ref, atol=1e-4, rtol=1e-4)

    print("KERNEL_OK")
</pallas_src>

<mosaic_0001>
module attributes {stable_mosaic.version = 11 : i64} {
  func.func @critic_kernel(%arg0: i32, %arg1: memref<8x32xf32, #tpu.memory_space<vmem>>, %arg2: memref<8x8xf32, #tpu.memory_space<vmem>>, %arg3: memref<32x32xf32, #tpu.memory_space<vmem>>, %arg4: memref<3x32xf32, #tpu.memory_space<vmem>>, %arg5: memref<32x64xf32, #tpu.memory_space<vmem>>, %arg6: memref<8x64xf32, #tpu.memory_space<vmem>>, %arg7: memref<64x64xf32, #tpu.memory_space<vmem>>, %arg8: memref<64x2xf32, #tpu.memory_space<vmem>>, %arg9: memref<3x64xf32, #tpu.memory_space<vmem>>, %arg10: memref<8x2xf32, #tpu.memory_space<vmem>>) attributes {dimension_semantics = [#tpu.dimension_semantics<parallel>], iteration_bounds = array<i64: 1>, scalar_prefetch = 0 : i64, scratch_operands = 0 : i64, tpu.core_type = #tpu.core_type<tc>, window_params = [{transform_indices = @transform_0, window_bounds = array<i64: 8, 32>}, {transform_indices = @transform_1, window_bounds = array<i64: 8, 8>}, {pipeline_mode = #tpu.pipeline_mode<synchronous>, transform_indices = @transform_2, window_bounds = array<i64: 32, 32>}, {pipeline_mode = #tpu.pipeline_mode<synchronous>, transform_indices = @transform_3, window_bounds = array<i64: 3, 32>}, {pipeline_mode = #tpu.pipeline_mode<synchronous>, transform_indices = @transform_4, window_bounds = array<i64: 32, 64>}, {pipeline_mode = #tpu.pipeline_mode<synchronous>, transform_indices = @transform_5, window_bounds = array<i64: 8, 64>}, {pipeline_mode = #tpu.pipeline_mode<synchronous>, transform_indices = @transform_6, window_bounds = array<i64: 64, 64>}, {pipeline_mode = #tpu.pipeline_mode<synchronous>, transform_indices = @transform_7, window_bounds = array<i64: 64, 2>}, {pipeline_mode = #tpu.pipeline_mode<synchronous>, transform_indices = @transform_8, window_bounds = array<i64: 3, 64>}, {transform_indices = @transform_9, window_bounds = array<i64: 8, 2>}]} {
    %c0 = arith.constant 0 : index
    %c0_0 = arith.constant 0 : index
    %0 = vector.load %arg1[%c0, %c0_0] : memref<8x32xf32, #tpu.memory_space<vmem>>, vector<8x32xf32>
    %c0_1 = arith.constant 0 : index
    %c0_2 = arith.constant 0 : index
    %1 = vector.load %arg2[%c0_1, %c0_2] : memref<8x8xf32, #tpu.memory_space<vmem>>, vector<8x8xf32>
    %c0_3 = arith.constant 0 : index
    %c0_4 = arith.constant 0 : index
    %2 = vector.load %arg3[%c0_3, %c0_4] : memref<32x32xf32, #tpu.memory_space<vmem>>, vector<32x32xf32>
    %cst = arith.constant dense<0.000000e+00> : vector<8x32xf32>
    %3 = tpu.matmul %0, %2, %cst {dimension_numbers = #tpu.dot_dimension_numbers<[1], [0], [0], [1], [0, 0, 1, 1], [], []>} : vector<8x32xf32>, vector<32x32xf32>, vector<8x32xf32> -> vector<8x32xf32>
    %c0_5 = arith.constant 0 : index
    %c0_6 = arith.constant 0 : index
    %4 = vector.load %arg4[%c0_5, %c0_6] : memref<3x32xf32, #tpu.memory_space<vmem>>, vector<1x32xf32>
    %5 = vector.broadcast %4 : vector<1x32xf32> to vector<8x32xf32>
    %6 = arith.addf %3, %5 : vector<8x32xf32>
    %cst_7 = arith.constant dense<0.000000e+00> : vector<8xf32>
    %7 = vector.multi_reduction <add>, %6, %cst_7 [1] : vector<8x32xf32> to vector<8xf32>
    %8 = vector.shape_cast %7 : vector<8xf32> to vector<8x1xf32>
    %cst_8 = arith.constant 3.200000e+01 : f32
    %9 = vector.broadcast %cst_8 : f32 to vector<8x1xf32>
    %10 = arith.divf %8, %9 : vector<8x1xf32>
    %11 = vector.broadcast %10 : vector<8x1xf32> to vector<8x32xf32>
    %12 = arith.subf %6, %11 : vector<8x32xf32>
    %13 = vector.broadcast %10 : vector<8x1xf32> to vector<8x32xf32>
    %14 = arith.subf %6, %13 : vector<8x32xf32>
    %15 = arith.mulf %12, %14 : vector<8x32xf32>
    %cst_9 = arith.constant dense<0.000000e+00> : vector<8xf32>
    %16 = vector.multi_reduction <add>, %15, %cst_9 [1] : vector<8x32xf32> to vector<8xf32>
    %17 = vector.shape_cast %16 : vector<8xf32> to vector<8x1xf32>
    %cst_10 = arith.constant 3.200000e+01 : f32
    %18 = vector.broadcast %cst_10 : f32 to vector<8x1xf32>
    %19 = arith.divf %17, %18 : vector<8x1xf32>
    %20 = vector.broadcast %10 : vector<8x1xf32> to vector<8x32xf32>
    %21 = arith.subf %6, %20 : vector<8x32xf32>
    %cst_11 = arith.constant 9.99999974E-6 : f32
    %22 = vector.broadcast %cst_11 : f32 to vector<8x1xf32>
    %23 = arith.addf %19, %22 : vector<8x1xf32>
    %24 = math.rsqrt %23 : vector<8x1xf32>
    %25 = vector.broadcast %24 : vector<8x1xf32> to vector<8x32xf32>
    %26 = arith.mulf %21, %25 : vector<8x32xf32>
    %c1 = arith.constant 1 : index
    %c0_12 = arith.constant 0 : index
    %27 = vector.load %arg4[%c1, %c0_12] : memref<3x32xf32, #tpu.memory_space<vmem>>, vector<1x32xf32>
    %28 = vector.broadcast %27 : vector<1x32xf32> to vector<8x32xf32>
    %29 = arith.mulf %26, %28 : vector<8x32xf32>
    %c2 = arith.constant 2 : index
    %c0_13 = arith.constant 0 : index
    %30 = vector.load %arg4[%c2, %c0_13] : memref<3x32xf32, #tpu.memory_space<vmem>>, vector<1x32xf32>
    %31 = vector.broadcast %30 : vector<1x32xf32> to vector<8x32xf32>
    %32 = arith.addf %29, %31 : vector<8x32xf32>
    %33 = math.tanh %32 : vector<8x32xf32>
    %c0_14 = arith.constant 0 : index
    %c0_15 = arith.constant 0 : index
    %34 = vector.load %arg5[%c0_14, %c0_15] : memref<32x64xf32, #tpu.memory_space<vmem>>, vector<32x64xf32>
    %cst_16 = arith.constant dense<0.000000e+00> : vector<8x64xf32>
    %35 = tpu.matmul %33, %34, %cst_16 {dimension_numbers = #tpu.dot_dimension_numbers<[1], [0], [0], [1], [0, 0, 1, 1], [], []>} : vector<8x32xf32>, vector<32x64xf32>, vector<8x64xf32> -> vector<8x64xf32>
    %c0_17 = arith.constant 0 : index
    %c0_18 = arith.constant 0 : index
    %36 = vector.load %arg6[%c0_17, %c0_18] : memref<8x64xf32, #tpu.memory_space<vmem>>, vector<8x64xf32>
    %cst_19 = arith.constant dense<0.000000e+00> : vector<8x64xf32>
    %37 = tpu.matmul %1, %36, %cst_19 {dimension_numbers = #tpu.dot_dimension_numbers<[1], [0], [0], [1], [0, 0, 1, 1], [], []>} : vector<8x8xf32>, vector<8x64xf32>, vector<8x64xf32> -> vector<8x64xf32>
    %38 = arith.addf %35, %37 : vector<8x64xf32>
    %c0_20 = arith.constant 0 : index
    %c0_21 = arith.constant 0 : index
    %39 = vector.load %arg9[%c0_20, %c0_21] : memref<3x64xf32, #tpu.memory_space<vmem>>, vector<1x64xf32>
    %40 = vector.broadcast %39 : vector<1x64xf32> to vector<8x64xf32>
    %41 = arith.addf %38, %40 : vector<8x64xf32>
    %cst_22 = arith.constant 0.000000e+00 : f32
    %42 = vector.broadcast %cst_22 : f32 to vector<8x64xf32>
    %43 = arith.maximumf %41, %42 : vector<8x64xf32>
    %c0_23 = arith.constant 0 : index
    %c0_24 = arith.constant 0 : index
    %44 = vector.load %arg7[%c0_23, %c0_24] : memref<64x64xf32, #tpu.memory_space<vmem>>, vector<64x64xf32>
    %cst_25 = arith.constant dense<0.000000e+00> : vector<8x64xf32>
    %45 = tpu.matmul %43, %44, %cst_25 {dimension_numbers = #tpu.dot_dimension_numbers<[1], [0], [0], [1], [0, 0, 1, 1], [], []>} : vector<8x64xf32>, vector<64x64xf32>, vector<8x64xf32> -> vector<8x64xf32>
    %c1_26 = arith.constant 1 : index
    %c0_27 = arith.constant 0 : index
    %46 = vector.load %arg9[%c1_26, %c0_27] : memref<3x64xf32, #tpu.memory_space<vmem>>, vector<1x64xf32>
    %47 = vector.broadcast %46 : vector<1x64xf32> to vector<8x64xf32>
    %48 = arith.addf %45, %47 : vector<8x64xf32>
    %cst_28 = arith.constant 0.000000e+00 : f32
    %49 = vector.broadcast %cst_28 : f32 to vector<8x64xf32>
    %50 = arith.maximumf %48, %49 : vector<8x64xf32>
    %c0_29 = arith.constant 0 : index
    %c0_30 = arith.constant 0 : index
    %51 = vector.load %arg8[%c0_29, %c0_30] : memref<64x2xf32, #tpu.memory_space<vmem>>, vector<64x2xf32>
    %cst_31 = arith.constant dense<0.000000e+00> : vector<8x2xf32>
    %52 = tpu.matmul %50, %51, %cst_31 {dimension_numbers = #tpu.dot_dimension_numbers<[1], [0], [0], [1], [0, 0, 1, 1], [], []>} : vector<8x64xf32>, vector<64x2xf32>, vector<8x2xf32> -> vector<8x2xf32>
    %c2_32 = arith.constant 2 : index
    %c0_33 = arith.constant 0 : index
    %53 = vector.load %arg9[%c2_32, %c0_33] : memref<3x64xf32, #tpu.memory_space<vmem>>, vector<1x2xf32>
    %54 = vector.broadcast %53 : vector<1x2xf32> to vector<8x2xf32>
    %55 = arith.addf %52, %54 : vector<8x2xf32>
    %c0_34 = arith.constant 0 : index
    %c0_35 = arith.constant 0 : index
    %56 = vector.load %arg10[%c0_34, %c0_35] : memref<8x2xf32, #tpu.memory_space<vmem>>, vector<8x2xf32>
    tpu.vector_store %arg10[%c0_34, %c0_35], %55 {strides = array<i32>} : memref<8x2xf32, #tpu.memory_space<vmem>>, vector<8x2xf32>,
    return
  }
  func.func @transform_0(%arg0: i32) -> (i32, i32) {
    %c0_i32 = arith.constant 0 : i32
    %c0_i32_0 = arith.constant 0 : i32
    return %arg0, %c0_i32 : i32, i32
  }
  func.func @transform_1(%arg0: i32) -> (i32, i32) {
    %c0_i32 = arith.constant 0 : i32
    %c0_i32_0 = arith.constant 0 : i32
    return %arg0, %c0_i32 : i32, i32
  }
  func.func @transform_2(%arg0: i32) -> (i32, i32) {
    %c0_i32 = arith.constant 0 : i32
    %c0_i32_0 = arith.constant 0 : i32
    %c0_i32_1 = arith.constant 0 : i32
    return %c0_i32, %c0_i32_0 : i32, i32
  }
  func.func @transform_3(%arg0: i32) -> (i32, i32) {
    %c0_i32 = arith.constant 0 : i32
    %c0_i32_0 = arith.constant 0 : i32
    %c0_i32_1 = arith.constant 0 : i32
    return %c0_i32, %c0_i32_0 : i32, i32
  }
  func.func @transform_4(%arg0: i32) -> (i32, i32) {
    %c0_i32 = arith.constant 0 : i32
    %c0_i32_0 = arith.constant 0 : i32
    %c0_i32_1 = arith.constant 0 : i32
    return %c0_i32, %c0_i32_0 : i32, i32
  }
  func.func @transform_5(%arg0: i32) -> (i32, i32) {
    %c0_i32 = arith.constant 0 : i32
    %c0_i32_0 = arith.constant 0 : i32
    %c0_i32_1 = arith.constant 0 : i32
    return %c0_i32, %c0_i32_0 : i32, i32
  }
  func.func @transform_6(%arg0: i32) -> (i32, i32) {
    %c0_i32 = arith.constant 0 : i32
    %c0_i32_0 = arith.constant 0 : i32
    %c0_i32_1 = arith.constant 0 : i32
    return %c0_i32, %c0_i32_0 : i32, i32
  }
  func.func @transform_7(%arg0: i32) -> (i32, i32) {
    %c0_i32 = arith.constant 0 : i32
    %c0_i32_0 = arith.constant 0 : i32
    %c0_i32_1 = arith.constant 0 : i32
    return %c0_i32, %c0_i32_0 : i32, i32
  }
  func.func @transform_8(%arg0: i32) -> (i32, i32) {
    %c0_i32 = arith.constant 0 : i32
    %c0_i32_0 = arith.constant 0 : i32
    %c0_i32_1 = arith.constant 0 : i32
    return %c0_i32, %c0_i32_0 : i32, i32
  }
  func.func @transform_9(%arg0: i32) -> (i32, i32) {
    %c0_i32 = arith.constant 0 : i32
    %c0_i32_0 = arith.constant 0 : i32
    return %arg0, %c0_i32 : i32, i32
  }
}

</mosaic_0001>

<bundles_post_ra>
// kernel: tpu_custom_call.1
= control target key start
LH: loop header
LB: loop body
LE: loop exit
PB: predicated region body
PF: predicated region fallthrough
CT: control target
= control target key end

     0   :  { %14 = vsyncpa [#allocation3], 0  ;;  %s639_s0 = inlined_call_operand.hbm [shape: f32[8,32], index: 0, kind: input, shape index: {}]   ;;  %s640_s1 = inlined_call_operand.hbm [shape: f32[8,8], index: 1, kind: input, shape index: {}]   ;;  %s641_s2 = inlined_call_operand.hbm [shape: f32[32,32], index: 2, kind: input, shape index: {}]   ;;  %s642_s3 = inlined_call_operand.hbm [shape: f32[3,32], index: 3, kind: input, shape index: {}]   ;;  %s643_s4 = inlined_call_operand.hbm [shape: f32[32,64], index: 4, kind: input, shape index: {}]   ;;  %s644_s5 = inlined_call_operand.hbm [shape: f32[8,64], index: 5, kind: input, shape index: {}]   ;;  %s645_s6 = inlined_call_operand.vmem [shape: f32[64,64], index: 6, kind: input, shape index: {}]   ;;  %s646_s7 = inlined_call_operand.vmem [shape: f32[64,2], index: 7, kind: input, shape index: {}]   ;;  %s647_s8 = inlined_call_operand.vmem [shape: f32[3,64], index: 8, kind: input, shape index: {}]   ;;  %s648_s9 = inlined_call_operand.vmem [shape: f32[8,2], index: 9, kind: output, shape index: {}]  }
   0x1   :  { %15 = vsyncpa [#allocation5], 0 }
   0x2   :  { %16 = vsyncpa [#allocation8], 0  ;;  %s34_s11 = sshll.u32 %s640_s1, 4  ;;  %s35_s11 = int_to_ptr.hbm [resolvable:$true] %s34_s11 }
   0x3   :  { %17 = vsyncpa [#allocation11], 0  ;;  %s498_s12 = smov [#allocation4]   ;;  %s58_s16 = sshll.u32 %s642_s3, 4  ;;  %s59_s16 = int_to_ptr.hbm [resolvable:$true] %s58_s16 }
   0x4   :  { %s36_s13 = sshll.u32 %s498_s12, 4  ;;  %s499_s17 = smov [#allocation7]   ;;  %s37_s13 = int_to_ptr.vmem [resolvable:$true] %s36_s13 }
   0x5   :  { %39 = dma.hbm_to_vmem [thread:$0]  %s35_s11, 128, %s37_s13, [#allocation5]  }
   0x6   :  { %s60_s18 = sshll.u32 %s499_s17, 4  ;;  %s23_s21 = sshll.u32 %s639_s0, 4  ;;  %s61_s18 = int_to_ptr.vmem [resolvable:$true] %s60_s18  ;;  %s24_s21 = int_to_ptr.hbm [resolvable:$true] %s23_s21 }
   0x7   :  { %63 = dma.hbm_to_vmem [thread:$0]  %s59_s16, 64, %s61_s18, [#allocation8]  }
   0x8   :  { %s44_s23 = sshll.u32 %s641_s2, 4  ;;  %s500_s24 = smov [#allocation2]   ;;  %s45_s23 = int_to_ptr.hbm [resolvable:$true] %s44_s23 }
   0x9   :  { %s25_s25 = sshll.u32 %s500_s24, 4  ;;  %s501_s3 = smov [#allocation6]   ;;  %s26_s25 = int_to_ptr.vmem [resolvable:$true] %s25_s25 }
   0xa   :  { %28 = dma.hbm_to_vmem [thread:$0]  %s24_s21, 128, %s26_s25, [#allocation3]  }
   0xb   :  { %s46_s26 = sshll.u32 %s501_s3, 4  ;;  %s502_s27 = smov 128   ;;  %s47_s26 = int_to_ptr.vmem [resolvable:$true] %s46_s26 }
   0xc   :  { %s503_s28 = smov 8   ;;  %s68_s30 = sshll.u32 %s643_s4, 4  ;;  %s69_s30 = int_to_ptr.hbm [resolvable:$true] %s68_s30 }
   0xd   :  { %52 = dma.hbm_to_vmem [thread:$0]  %s45_s23, 512, %s47_s26, [#allocation5], %s502_s27, %s502_s27, %s503_s28  }
   0xe   :  { %s504_s10 = smov [#allocation9]   ;;  %s82_s13 = sshll.u32 %s644_s5, 4  ;;  %s83_s13 = int_to_ptr.hbm [resolvable:$true] %s82_s13 }
   0xf   :  { %s70_s11 = sshll.u32 %s504_s10, 4  ;;  %s505_s14 = smov [#allocation10]   ;;  %s71_s11 = int_to_ptr.vmem [resolvable:$true] %s70_s11 }
  0x10   :  { %76 = dma.hbm_to_vmem [thread:$0]  %s69_s30, 512, %s71_s11, [#allocation8], %s502_s27, %s502_s27, %s503_s28  }
  0x11   :  { %s84_s15 = sshll.u32 %s505_s14, 4  ;;  %s85_s15 = int_to_ptr.vmem [resolvable:$true] %s84_s15 }
  0x12   :  { %87 = dma.hbm_to_vmem [thread:$0]  %s83_s13, 128, %s85_s15, [#allocation11]  }
  0x13   :  { %490 = dma.done.wait [#allocation3], 128  }
  0x14   :  { %491 = vsyncadd [#allocation3], 4294967168 }
  0x15   :  { %492 = dma.done.wait [#allocation5], 640  }
  0x16   :  { %493 = vsyncadd [#allocation5], 4294966656 }
  0x17   :  { %494 = dma.done.wait [#allocation8], 576  }
  0x18   :  { %495 = vsyncadd [#allocation8], 4294966720 }
  0x19   :  { %496 = dma.done.wait [#allocation11], 128  }
  0x1a   :  { %497 = vsyncadd [#allocation11], 4294967168  ;;  %v123_v0 = vld [vmem:[#allocation6 + $0x18] sm:$0xff]  ;;  %v122_v1 = vld [vmem:[#allocation6 + $0x10] sm:$0xff]  ;;  %vm126_vm0 = vcmask 261120   ;;  %v506_v9 = vmov 32.0  }
  0x1b   :  { %142 = vmatpush.msra.mxu0 %v123_v0  ;;  %v121_v2 = vld [vmem:[#allocation6 + $0x8] sm:$0xff]  ;;  %v120_v3 = vld [vmem:[#allocation6] sm:$0xff]  ;;  %v118_v4 = vld [vmem:[#allocation2] sm:$0xff]  ;;  %340 = vrcp.f32 %v506_v9  ;;  %vm191_vm2 = vcmask 64512   ;;  %vm252_vm6 = vcmask 523264   ;;  %vm310_vm7 = vcmask 15360  }
  0x1c   :  { %v334_v5 = vld [vmem:[#allocation7] ss:$0 sm:$0xff]  ;;  %v190_v21 = vld [vmem:[#allocation10] sm:$0xff]  ;;  %v119_v22 = vld [vmem:[#allocation4] sm:$0xff] }
  0x1d   :  { %143 = vmatpush.msra.mxu0 %v122_v1  ;;  %210 = vmatpush.msra.mxu2 %v190_v21  ;;  %v189_v23 = vld [vmem:[#allocation9 + $0x18] sm:$0xff]  ;;  %v188_v24 = vld [vmem:[#allocation9 + $0x10] sm:$0xff]  ;;  %v187_v25 = vld [vmem:[#allocation9 + $0x8] sm:$0xff] }
  0x1e   :  { %321 = vmatmul.msk.f32.vlgmr.msra.gmra.mxu2 %vm191_vm2, %v119_v22  ;;  %v186_v27 = vld [vmem:[#allocation9] sm:$0xff]  ;;  %v335_v36 = vld [vmem:[#allocation7 + $0x1] ss:$0 sm:$0xff]  ;;  %v336_v38 = vld [vmem:[#allocation7 + $0x2] ss:$0 sm:$0xff] }
  0x1f   :  { %144 = vmatpush.msra.mxu0 %v121_v2  ;;  %230 = vmatpush.msrb.mxu2 %v189_v23  ;;  %v249_v43 = vld [vmem:[%s645_s6 + $0x38] sm:$0xff]  ;;  %v248_v44 = vld [vmem:[%s645_s6 + $0x30] sm:$0xff]  ;;  %v247_v45 = vld [vmem:[%s645_s6 + $0x28] sm:$0xff] }
  0x20   :  { %264 = vmatpush.msra.mxu3 %v249_v43  ;;  %v246_v46 = vld [vmem:[%s645_s6 + $0x20] sm:$0xff]  ;;  %v245_v47 = vld [vmem:[%s645_s6 + $0x18] sm:$0xff]  ;;  %v244_v48 = vld [vmem:[%s645_s6 + $0x10] sm:$0xff] }
  0x21   :  { %145 = vmatpush.msra.mxu0 %v120_v3  ;;  %v341_v10 = vpop.eup %340  ;;  %231 = vmatpush.msrb.mxu2 %v188_v24  ;;  %v243_v49 = vld [vmem:[%s645_s6 + $0x8] sm:$0xff]  ;;  %v242_v50 = vld [vmem:[%s645_s6] sm:$0xff]  ;;  %v284_v51 = vld [vmem:[%s646_s7 + $0x38] sm:$0xff] }
  0x22   :  { %320 = vmatmul.msk.f32.vlgmr.msra.gmra.mxu0 %vm126_vm0, %v118_v4  ;;  %v154_v11 = vmul.f32 32.0, %v341_v10  ;;  %vm158_vm1 = vweird.f32 %v341_v10  ;;  %265 = vmatpush.msra.mxu3 %v248_v44  ;;  %v283_v52 = vld [vmem:[%s646_s7 + $0x30] sm:$0xff]  ;;  %v282_v53 = vld [vmem:[%s646_s7 + $0x28] sm:$0xff]  ;;  %v281_v54 = vld [vmem:[%s646_s7 + $0x20] sm:$0xff] }
  0x23   :  { %232 = vmatpush.msrb.mxu2 %v187_v25  ;;  %298 = vmatpush.msra.mxu1 %v284_v51  ;;  %v280_v55 = vld [vmem:[%s646_s7 + $0x18] sm:$0xff]  ;;  %v337_v57 = vld [vmem:[%s647_s8] ss:$0 sm:$0xff]  ;;  %v279_v62 = vld [vmem:[%s646_s7 + $0x10] sm:$0xff] }
  0x24   :  { %v155_v12 = vsub.f32 1.0, %v154_v11  ;;  %266 = vmatpush.msra.mxu3 %v247_v45  ;;  %v278_v63 = vld [vmem:[%s646_s7 + $0x8] sm:$0xff]  ;;  %v277_v0 = vld [vmem:[%s646_s7] sm:$0xff] }
  0x25   :  { %233 = vmatpush.msrb.mxu2 %v186_v27  ;;  %299 = vmatpush.msra.mxu1 %v283_v52  ;;  %v338_v1 = vld [vmem:[%s647_s8 + $0x1] ss:$0 sm:$0xff] }
  0x26   :  { %v156_v13 = vmul.f32 %v341_v10, %v155_v12  ;;  %267 = vmatpush.msra.mxu3 %v246_v46 }
  0x27   :  { %300 = vmatpush.msra.mxu1 %v282_v53 }
  0x28   :  { %v157_v14 = vadd.f32 %v341_v10, %v156_v13  ;;  %268 = vmatpush.msra.mxu3 %v245_v47 }
  0x29   :  { %301 = vmatpush.msra.mxu1 %v281_v54 }
  0x2a   :  { %v159_v15 = vsel %vm158_vm1, %v341_v10, %v157_v14  ;;  %269 = vmatpush.msra.mxu3 %v244_v48 }
  0x2b   :  { %302 = vmatpush.msra.mxu1 %v280_v55 }
  0x2c   :  { %270 = vmatpush.msra.mxu3 %v243_v49 }
  0x2d   :  { %303 = vmatpush.msra.mxu1 %v279_v62 }
  0x2e   :  { %271 = vmatpush.msra.mxu3 %v242_v50 }
  0x2f   :  { %304 = vmatpush.msra.mxu1 %v278_v63 }
  0x31   :  { %305 = vmatpush.msra.mxu1 %v277_v0 }
  0x9f   :  { %v147_v6 = vpop.f32.mrf.mxu0 }
  0xa0   :  { %v148_v7 = vadd.f32 %v334_v5, %v147_v6  ;;  %v339_v5 = vld [vmem:[%s647_s8 + $0x2] ss:$0 sm:$0xff] }
  0xa1   :  { %v212_v56 = vpop.f32.mrf.mxu2 }
  0xa2   :  { %v150_v8 = vsel %vm126_vm0, %v148_v7, 0.0 }
  0xa3   :  { %151 = vadd.xlane.f32.xlu0 %v150_v8 }
 0x116   :  { %v152_v16 = vpop.xlane.xlu0 %151 }
 0x117   :  { %v160_v17 = vmul.f32 %v159_v15, %v152_v16 }
 0x119   :  { %v161_v18 = vsub.f32 %v148_v7, %v160_v17 }
 0x11b   :  { %v162_v19 = vmul.f32 %v161_v18, %v161_v18 }
 0x11d   :  { %v163_v20 = vsel %vm126_vm0, %v162_v19, 0.0 }
 0x11e   :  { %164 = vadd.xlane.f32.xlu0 %v163_v20 }
 0x191   :  { %v165_v26 = vpop.xlane.xlu0 %164 }
 0x192   :  { %v166_v28 = vmul.f32 %v165_v26, %v159_v15 }
 0x194   :  { %v167_v29 = vadd.f32 1e-05, %v166_v28 }
 0x196   :  { %342 = vrsqrt.f32 %v167_v29  ;;  %vm174_vm4 = vweird.f32 %v167_v29 }
 0x19c   :  { %v343_v30 = vpop.eup %342 }
 0x19d   :  { %v169_v31 = vmul.f32 %v343_v30, %v167_v29  ;;  %vm175_vm3 = vweird.f32 %v343_v30 }
 0x19e   :  { %vm176_vm5 = vmor %vm174_vm4, %vm175_vm3 }
 0x19f   :  { %v170_v32 = vmul.f32 %v343_v30, %v169_v31 }
 0x1a1   :  { %v171_v33 = vmul.f32 0.5, %v170_v32 }
 0x1a3   :  { %v172_v34 = vsub.f32 1.5, %v171_v33 }
 0x1a5   :  { %v173_v35 = vmul.f32 %v343_v30, %v172_v34 }
 0x1a7   :  { %v177_v37 = vsel %vm176_vm5, %v343_v30, %v173_v35 }
 0x1a8   :  { %v178_v39 = vmul.f32 %v177_v37, %v161_v18 }
 0x1aa   :  { %v181_v40 = vmul.f32 %v335_v36, %v178_v39 }
 0x1ac   :  { %v184_v41 = vadd.f32 %v336_v38, %v181_v40 }
 0x1ae   :  { %344 = vtanh.f32 %v184_v41 }
 0x1b4   :  { %v345_v42 = vpop.eup %344 }
 0x1b5   :  { %322 = vmatmul.msk.f32.vlgmr.msrb.gmra.mxu2 %vm126_vm0, %v345_v42 }
 0x238   :  { %v235_v58 = vpop.f32.mrf.mxu2 }
 0x239   :  { %v236_v59 = vadd.f32 %v235_v58, %v212_v56 }
 0x23b   :  { %v240_v60 = vadd.f32 %v337_v57, %v236_v59 }
 0x23d   :  { %v241_v61 = vmax.f32 %v240_v60, 0.0 }
 0x23f   :  { %323 = vmatmul.msk.f32.vlgmr.msra.gmra.mxu3 %vm252_vm6, %v241_v61 }
 0x2c2   :  { %v273_v2 = vpop.f32.mrf.mxu3 }
 0x2c3   :  { %v274_v3 = vadd.f32 %v338_v1, %v273_v2 }
 0x2c5   :  { %v276_v4 = vmax.f32 %v274_v3, 0.0 }
 0x2c7   :  { %324 = vmatmul.msk.f32.vlgmr.msra.gmra.mxu1 %vm252_vm6, %v276_v4 }
 0x344   :  { %v307_v6 = vpop.f32.mrf.mxu1 }
 0x345   :  { %v308_v7 = vadd.f32 %v339_v5, %v307_v6 }
 0x347   :  { %311 = vst.msk [vmem:[%s648_s9] sm:$0xff] %vm310_vm7, %v308_v7 }
 0x348   :  { %316 = vsyncpa [#allocation3], 1 }
 0x349   :  { %317 = vsyncpa [#allocation5], 1 }
 0x34a   :  { %318 = vsyncpa [#allocation8], 1 }
 0x34b   :  { %319 = vsyncpa [#allocation11], 1 }

</bundles_post_ra>
